<compile_context>
chip_gen: v5e
topology: v5e:2x2
jax: 0.10.0
libtpu: 0.0.40
codegen_flags: <defaults>
</compile_context>

<pallas_src>
import functools

import jax
import jax.numpy as jnp
from jax.experimental import pallas as pl
from jax.experimental.pallas import tpu as pltpu

# ---- config (mirrors the PyTorch `config` dict, small synthetic sizes) ----
BLOCK_SIZE = 8       # block_size  (sequence length T == block_size here)
N_EMBD = 32          # n_embd
N_HEAD = 4           # n_head
HEAD_SIZE = N_EMBD // N_HEAD


def _block_kernel(x_ref, wqkv_ref, wp_ref, bp_ref, o_ref, *, batch, seq_len,
                  n_head):
    """Single-step kernel over the whole (B*T, C) activation slab.

    x_ref   : (B*T, C)  f32   flattened activations
    wqkv_ref: (C, 3C)   bf16  fused [Wq | Wk | Wv]; within each C-wide block,
                              columns h*hs:(h+1)*hs belong to head h
    wp_ref  : (C, C)    bf16  projection weight, pre-transposed (y = sa@Wp + b);
                              rows h*hs:(h+1)*hs belong to head h
    bp_ref  : (1, C)    f32   projection bias
    o_ref   : (B*T, C)  f32   output (residual included)
    """
    B, T = batch, seq_len
    x2d = x_ref[...]                                        # (B*T, C) f32
    BT, C = x2d.shape
    hs = C // n_head
    scale = float(hs) ** -0.5

    # --- one fused QKV matmul on the MXU (bf16 operands, f32 accumulate) ---
    qkv = jnp.dot(x2d.astype(jnp.bfloat16), wqkv_ref[...],
                  preferred_element_type=jnp.float32)       # (B*T, 3C)
    q = qkv[:, :C].reshape(B, T, C)
    k = qkv[:, C:2 * C].reshape(B, T, C)
    v = qkv[:, 2 * C:].reshape(B, T, C)

    # causal mask (lower triangular), shared by all batches / heads
    row = jax.lax.broadcasted_iota(jnp.int32, (T, T), 0)
    col = jax.lax.broadcasted_iota(jnp.int32, (T, T), 1)
    causal = (row >= col)[None, :, :]                       # (1, T, T)

    # residual and bias seed the projection accumulator (no concat needed)
    acc = x2d + bp_ref[...]                                 # (B*T, C) f32

    for h in range(n_head):
        sl = slice(h * hs, (h + 1) * hs)
        qh = q[:, :, sl].astype(jnp.bfloat16)               # (B, T, hs)
        kh = k[:, :, sl].astype(jnp.bfloat16)
        vh = v[:, :, sl].astype(jnp.bfloat16)

        # batched-over-B score matmul, softmax in f32
        s = jnp.einsum("btd,bsd->bts", qh, kh,
                       preferred_element_type=jnp.float32) * scale  # (B,T,T)
        s = jnp.where(causal, s, -jnp.inf)
        s_max = jnp.max(s, axis=-1, keepdims=True)
        p = jnp.exp(s - s_max)
        denom = jnp.sum(p, axis=-1, keepdims=True)
        p = p * pl.reciprocal(denom, approx=True)           # EUP reciprocal

        oh = jnp.einsum("bts,bsd->btd", p.astype(jnp.bfloat16), vh,
                        preferred_element_type=jnp.float32)  # (B, T, hs) f32

        # fold the head-concat into the projection: this head's output only
        # meets rows h*hs:(h+1)*hs of Wp -> accumulate its contribution.
        acc = acc + jnp.dot(oh.reshape(BT, hs).astype(jnp.bfloat16),
                            wp_ref[sl, :],
                            preferred_element_type=jnp.float32)

    o_ref[...] = acc


def block_forward(x, wq, wk, wv, w_proj, b_proj):
    """x: (B, T, C) float32.

    wq/wk/wv: (C, C) -- per-head weights concatenated along the output dim
              (columns h*HEAD_SIZE:(h+1)*HEAD_SIZE belong to head h).
    w_proj:   (C, C) pre-transposed so y = sa @ w_proj + b_proj.
    """
    B, T, C = x.shape
    x2d = x.reshape(B * T, C)
    # fuse the three projection weights into one (C, 3C) bf16 operand
    wqkv = jnp.concatenate([wq, wk, wv], axis=1).astype(jnp.bfloat16)
    wp = w_proj.astype(jnp.bfloat16)
    bp = b_proj.reshape(1, C).astype(jnp.float32)

    kernel = functools.partial(_block_kernel, batch=B, seq_len=T,
                               n_head=N_HEAD)
    out2d = pl.pallas_call(
        kernel,
        out_shape=jax.ShapeDtypeStruct((B * T, C), jnp.float32),
        grid=(1,),   # single step: the whole problem fits easily in VMEM
        in_specs=[
            pl.BlockSpec((B * T, C), lambda i: (0, 0)),
            pl.BlockSpec((C, 3 * C), lambda i: (0, 0)),
            pl.BlockSpec((C, C), lambda i: (0, 0)),
            pl.BlockSpec((1, C), lambda i: (0, 0)),
        ],
        out_specs=pl.BlockSpec((B * T, C), lambda i: (0, 0)),
        compiler_params=pltpu.CompilerParams(
            dimension_semantics=("arbitrary",)),
    )(x2d, wqkv, wp, bp)
    return out2d.reshape(B, T, C)


def _reference(x, wq, wk, wv, w_proj, b_proj):
    """Pure-JAX f32 reference matching the PyTorch semantics."""
    B, T, C = x.shape
    hs = HEAD_SIZE
    outs = []
    for h in range(N_HEAD):
        sl = slice(h * hs, (h + 1) * hs)
        q = x @ wq[:, sl]
        k = x @ wk[:, sl]
        v = x @ wv[:, sl]
        s = jnp.einsum("btd,bsd->bts", q, k) * (hs ** -0.5)
        mask = jnp.tril(jnp.ones((T, T), dtype=bool))
        s = jnp.where(mask, s, -jnp.inf)
        p = jax.nn.softmax(s, axis=-1)
        outs.append(jnp.einsum("bts,bsd->btd", p, v))
    sa = jnp.concatenate(outs, axis=-1)
    return x + sa @ w_proj + b_proj


if __name__ == "__main__":
    key = jax.random.PRNGKey(0)
    kx, kq, kk, kv, kp, kb = jax.random.split(key, 6)

    B, T, C = 2, BLOCK_SIZE, N_EMBD
    x = jax.random.normal(kx, (B, T, C), dtype=jnp.float32)

    # nn.Linear(n_embd, head_size, bias=False) per head: weight (head_size, n_embd),
    # applied as x @ W.T.  We pre-transpose and concat heads -> (C, C).
    scale = C ** -0.5
    wq = jax.random.normal(kq, (C, C), dtype=jnp.float32) * scale
    wk = jax.random.normal(kk, (C, C), dtype=jnp.float32) * scale
    wv = jax.random.normal(kv, (C, C), dtype=jnp.float32) * scale
    # proj: nn.Linear(n_embd, n_embd) -> weight (C, C) applied as x @ W.T + b.
    # Stored pre-transposed so kernel does sa @ w_proj + b.
    w_proj = jax.random.normal(kp, (C, C), dtype=jnp.float32) * scale
    b_proj = jax.random.normal(kb, (C,), dtype=jnp.float32) * 0.1

    out = block_forward(x, wq, wk, wv, w_proj, b_proj)
    out = jax.block_until_ready(out)

    ref = _reference(x, wq, wk, wv, w_proj, b_proj)
    assert out.shape == (B, T, C)
    # bf16 matmul operands + approximate reciprocal -> looser tolerance than
    # the pure-f32 reference (values are O(1), error is well under 5e-2).
    assert jnp.allclose(out, ref, atol=5e-2, rtol=5e-2), "mismatch vs reference"

    print("KERNEL_OK")
</pallas_src>

<mosaic_0001>
module attributes {stable_mosaic.version = 11 : i64} {
  func.func @_block_kernel(%arg0: i32, %arg1: memref<16x32xf32, #tpu.memory_space<vmem>>, %arg2: memref<32x96xbf16, #tpu.memory_space<vmem>>, %arg3: memref<32x32xbf16, #tpu.memory_space<vmem>>, %arg4: memref<1x32xf32, #tpu.memory_space<vmem>>, %arg5: memref<16x32xf32, #tpu.memory_space<vmem>>) attributes {dimension_semantics = [#tpu.dimension_semantics<arbitrary>], iteration_bounds = array<i64: 1>, scalar_prefetch = 0 : i64, scratch_operands = 0 : i64, tpu.core_type = #tpu.core_type<tc>, window_params = [{pipeline_mode = #tpu.pipeline_mode<synchronous>, transform_indices = @transform_0, window_bounds = array<i64: 16, 32>}, {pipeline_mode = #tpu.pipeline_mode<synchronous>, transform_indices = @transform_1, window_bounds = array<i64: 32, 96>}, {pipeline_mode = #tpu.pipeline_mode<synchronous>, transform_indices = @transform_2, window_bounds = array<i64: 32, 32>}, {pipeline_mode = #tpu.pipeline_mode<synchronous>, transform_indices = @transform_3, window_bounds = array<i64: 1, 32>}, {pipeline_mode = #tpu.pipeline_mode<synchronous>, transform_indices = @transform_4, window_bounds = array<i64: 16, 32>}]} {
    %c0 = arith.constant 0 : index
    %c0_0 = arith.constant 0 : index
    %0 = vector.load %arg1[%c0, %c0_0] : memref<16x32xf32, #tpu.memory_space<vmem>>, vector<16x32xf32>
    %1 = arith.truncf %0 : vector<16x32xf32> to vector<16x32xbf16>
    %c0_1 = arith.constant 0 : index
    %c0_2 = arith.constant 0 : index
    %2 = vector.load %arg2[%c0_1, %c0_2] : memref<32x96xbf16, #tpu.memory_space<vmem>>, vector<32x96xbf16>
    %cst = arith.constant dense<0.000000e+00> : vector<16x96xf32>
    %3 = tpu.matmul %1, %2, %cst {dimension_numbers = #tpu.dot_dimension_numbers<[1], [0], [0], [1], [0, 0, 1, 1], [], []>} : vector<16x32xbf16>, vector<32x96xbf16>, vector<16x96xf32> -> vector<16x96xf32>
    %4 = vector.extract_strided_slice %3 {offsets = [0, 0], sizes = [16, 32], strides = [1, 1]} : vector<16x96xf32> to vector<16x32xf32>
    %5 = vector.shape_cast %4 : vector<16x32xf32> to vector<2x8x32xf32>
    %6 = vector.extract_strided_slice %3 {offsets = [0, 32], sizes = [16, 32], strides = [1, 1]} : vector<16x96xf32> to vector<16x32xf32>
    %7 = vector.shape_cast %6 : vector<16x32xf32> to vector<2x8x32xf32>
    %8 = vector.extract_strided_slice %3 {offsets = [0, 64], sizes = [16, 32], strides = [1, 1]} : vector<16x96xf32> to vector<16x32xf32>
    %9 = vector.shape_cast %8 : vector<16x32xf32> to vector<2x8x32xf32>
    %10 = tpu.iota {dimensions = array<i32: 0>} : vector<8x8xi32>
    %11 = tpu.iota {dimensions = array<i32: 1>} : vector<8x8xi32>
    %12 = arith.cmpi sge, %10, %11 : vector<8x8xi32>
    %13 = vector.shape_cast %12 : vector<8x8xi1> to vector<1x8x8xi1>
    %c0_3 = arith.constant 0 : index
    %c0_4 = arith.constant 0 : index
    %14 = vector.load %arg4[%c0_3, %c0_4] : memref<1x32xf32, #tpu.memory_space<vmem>>, vector<1x32xf32>
    %15 = vector.broadcast %14 : vector<1x32xf32> to vector<16x32xf32>
    %16 = arith.addf %0, %15 : vector<16x32xf32>
    %17 = vector.extract_strided_slice %5 {offsets = [0, 0, 0], sizes = [2, 8, 8], strides = [1, 1, 1]} : vector<2x8x32xf32> to vector<2x8x8xf32>
    %18 = arith.truncf %17 : vector<2x8x8xf32> to vector<2x8x8xbf16>
    %19 = vector.extract_strided_slice %7 {offsets = [0, 0, 0], sizes = [2, 8, 8], strides = [1, 1, 1]} : vector<2x8x32xf32> to vector<2x8x8xf32>
    %20 = arith.truncf %19 : vector<2x8x8xf32> to vector<2x8x8xbf16>
    %21 = vector.extract_strided_slice %9 {offsets = [0, 0, 0], sizes = [2, 8, 8], strides = [1, 1, 1]} : vector<2x8x32xf32> to vector<2x8x8xf32>
    %22 = arith.truncf %21 : vector<2x8x8xf32> to vector<2x8x8xbf16>
    "tpu.trace_start"() <{level = 10 : i32, message = "btd,bsd->bts"}> : () -> ()
    %cst_5 = arith.constant dense<0.000000e+00> : vector<2x8x8xf32>
    %23 = tpu.matmul %18, %20, %cst_5 {dimension_numbers = #tpu.dot_dimension_numbers<[2], [2], [1], [1], [0, 0, 0, 1, 1, 1], [0], [0]>} : vector<2x8x8xbf16>, vector<2x8x8xbf16>, vector<2x8x8xf32> -> vector<2x8x8xf32>
    "tpu.trace_stop"() : () -> ()
    %cst_6 = arith.constant 0.353553385 : f32
    %24 = vector.broadcast %cst_6 : f32 to vector<2x8x8xf32>
    %25 = arith.mulf %23, %24 : vector<2x8x8xf32>
    %cst_7 = arith.constant 0xFF800000 : f32
    %26 = vector.shape_cast %13 : vector<1x8x8xi1> to vector<1x8x8xi1>
    %27 = vector.broadcast %26 : vector<1x8x8xi1> to vector<2x8x8xi1>
    %28 = vector.broadcast %cst_7 : f32 to vector<2x8x8xf32>
    %29 = arith.select %27, %25, %28 : vector<2x8x8xi1>, vector<2x8x8xf32>
    %cst_8 = arith.constant dense<0xFF800000> : vector<2x8xf32>
    %30 = vector.multi_reduction <maximumf>, %29, %cst_8 [2] : vector<2x8x8xf32> to vector<2x8xf32>
    %31 = vector.shape_cast %30 : vector<2x8xf32> to vector<2x8x1xf32>
    %32 = vector.broadcast %31 : vector<2x8x1xf32> to vector<2x8x8xf32>
    %33 = arith.subf %29, %32 : vector<2x8x8xf32>
    %34 = math.exp %33 : vector<2x8x8xf32>
    %cst_9 = arith.constant dense<0.000000e+00> : vector<2x8xf32>
    %35 = vector.multi_reduction <add>, %34, %cst_9 [2] : vector<2x8x8xf32> to vector<2x8xf32>
    %36 = vector.shape_cast %35 : vector<2x8xf32> to vector<2x8x1xf32>
    %37 = tpu.reciprocal %36 {approx = true} : vector<2x8x1xf32> -> vector<2x8x1xf32>
    %38 = vector.broadcast %37 : vector<2x8x1xf32> to vector<2x8x8xf32>
    %39 = arith.mulf %34, %38 : vector<2x8x8xf32>
    %40 = arith.truncf %39 : vector<2x8x8xf32> to vector<2x8x8xbf16>
    "tpu.trace_start"() <{level = 10 : i32, message = "bts,bsd->btd"}> : () -> ()
    %cst_10 = arith.constant dense<0.000000e+00> : vector<2x8x8xf32>
    %41 = tpu.matmul %40, %22, %cst_10 {dimension_numbers = #tpu.dot_dimension_numbers<[2], [1], [1], [2], [0, 0, 0, 1, 1, 2], [0], [0]>} : vector<2x8x8xbf16>, vector<2x8x8xbf16>, vector<2x8x8xf32> -> vector<2x8x8xf32>
    "tpu.trace_stop"() : () -> ()
    %42 = vector.shape_cast %41 : vector<2x8x8xf32> to vector<16x8xf32>
    %43 = arith.truncf %42 : vector<16x8xf32> to vector<16x8xbf16>
    %c0_11 = arith.constant 0 : index
    %c0_12 = arith.constant 0 : index
    %44 = vector.load %arg3[%c0_11, %c0_12] : memref<32x32xbf16, #tpu.memory_space<vmem>>, vector<8x32xbf16>
    %cst_13 = arith.constant dense<0.000000e+00> : vector<16x32xf32>
    %45 = tpu.matmul %43, %44, %cst_13 {dimension_numbers = #tpu.dot_dimension_numbers<[1], [0], [0], [1], [0, 0, 1, 1], [], []>} : vector<16x8xbf16>, vector<8x32xbf16>, vector<16x32xf32> -> vector<16x32xf32>
    %46 = arith.addf %16, %45 : vector<16x32xf32>
    %47 = vector.extract_strided_slice %5 {offsets = [0, 0, 8], sizes = [2, 8, 8], strides = [1, 1, 1]} : vector<2x8x32xf32> to vector<2x8x8xf32>
    %48 = arith.truncf %47 : vector<2x8x8xf32> to vector<2x8x8xbf16>
    %49 = vector.extract_strided_slice %7 {offsets = [0, 0, 8], sizes = [2, 8, 8], strides = [1, 1, 1]} : vector<2x8x32xf32> to vector<2x8x8xf32>
    %50 = arith.truncf %49 : vector<2x8x8xf32> to vector<2x8x8xbf16>
    %51 = vector.extract_strided_slice %9 {offsets = [0, 0, 8], sizes = [2, 8, 8], strides = [1, 1, 1]} : vector<2x8x32xf32> to vector<2x8x8xf32>
    %52 = arith.truncf %51 : vector<2x8x8xf32> to vector<2x8x8xbf16>
    "tpu.trace_start"() <{level = 10 : i32, message = "btd,bsd->bts"}> : () -> ()
    %cst_14 = arith.constant dense<0.000000e+00> : vector<2x8x8xf32>
    %53 = tpu.matmul %48, %50, %cst_14 {dimension_numbers = #tpu.dot_dimension_numbers<[2], [2], [1], [1], [0, 0, 0, 1, 1, 1], [0], [0]>} : vector<2x8x8xbf16>, vector<2x8x8xbf16>, vector<2x8x8xf32> -> vector<2x8x8xf32>
    "tpu.trace_stop"() : () -> ()
    %cst_15 = arith.constant 0.353553385 : f32
    %54 = vector.broadcast %cst_15 : f32 to vector<2x8x8xf32>
    %55 = arith.mulf %53, %54 : vector<2x8x8xf32>
    %cst_16 = arith.constant 0xFF800000 : f32
    %56 = vector.shape_cast %13 : vector<1x8x8xi1> to vector<1x8x8xi1>
    %57 = vector.broadcast %56 : vector<1x8x8xi1> to vector<2x8x8xi1>
    %58 = vector.broadcast %cst_16 : f32 to vector<2x8x8xf32>
    %59 = arith.select %57, %55, %58 : vector<2x8x8xi1>, vector<2x8x8xf32>
    %cst_17 = arith.constant dense<0xFF800000> : vector<2x8xf32>
    %60 = vector.multi_reduction <maximumf>, %59, %cst_17 [2] : vector<2x8x8xf32> to vector<2x8xf32>
    %61 = vector.shape_cast %60 : vector<2x8xf32> to vector<2x8x1xf32>
    %62 = vector.broadcast %61 : vector<2x8x1xf32> to vector<2x8x8xf32>
    %63 = arith.subf %59, %62 : vector<2x8x8xf32>
    %64 = math.exp %63 : vector<2x8x8xf32>
    %cst_18 = arith.constant dense<0.000000e+00> : vector<2x8xf32>
    %65 = vector.multi_reduction <add>, %64, %cst_18 [2] : vector<2x8x8xf32> to vector<2x8xf32>
    %66 = vector.shape_cast %65 : vector<2x8xf32> to vector<2x8x1xf32>
    %67 = tpu.reciprocal %66 {approx = true} : vector<2x8x1xf32> -> vector<2x8x1xf32>
    %68 = vector.broadcast %67 : vector<2x8x1xf32> to vector<2x8x8xf32>
    %69 = arith.mulf %64, %68 : vector<2x8x8xf32>
    %70 = arith.truncf %69 : vector<2x8x8xf32> to vector<2x8x8xbf16>
    "tpu.trace_start"() <{level = 10 : i32, message = "bts,bsd->btd"}> : () -> ()
    %cst_19 = arith.constant dense<0.000000e+00> : vector<2x8x8xf32>
    %71 = tpu.matmul %70, %52, %cst_19 {dimension_numbers = #tpu.dot_dimension_numbers<[2], [1], [1], [2], [0, 0, 0, 1, 1, 2], [0], [0]>} : vector<2x8x8xbf16>, vector<2x8x8xbf16>, vector<2x8x8xf32> -> vector<2x8x8xf32>
    "tpu.trace_stop"() : () -> ()
    %72 = vector.shape_cast %71 : vector<2x8x8xf32> to vector<16x8xf32>
    %73 = arith.truncf %72 : vector<16x8xf32> to vector<16x8xbf16>
    %c8 = arith.constant 8 : index
    %c0_20 = arith.constant 0 : index
    %74 = vector.load %arg3[%c8, %c0_20] : memref<32x32xbf16, #tpu.memory_space<vmem>>, vector<8x32xbf16>
    %cst_21 = arith.constant dense<0.000000e+00> : vector<16x32xf32>
    %75 = tpu.matmul %73, %74, %cst_21 {dimension_numbers = #tpu.dot_dimension_numbers<[1], [0], [0], [1], [0, 0, 1, 1], [], []>} : vector<16x8xbf16>, vector<8x32xbf16>, vector<16x32xf32> -> vector<16x32xf32>
    %76 = arith.addf %46, %75 : vector<16x32xf32>
    %77 = vector.extract_strided_slice %5 {offsets = [0, 0, 16], sizes = [2, 8, 8], strides = [1, 1, 1]} : vector<2x8x32xf32> to vector<2x8x8xf32>
    %78 = arith.truncf %77 : vector<2x8x8xf32> to vector<2x8x8xbf16>
    %79 = vector.extract_strided_slice %7 {offsets = [0, 0, 16], sizes = [2, 8, 8], strides = [1, 1, 1]} : vector<2x8x32xf32> to vector<2x8x8xf32>
    %80 = arith.truncf %79 : vector<2x8x8xf32> to vector<2x8x8xbf16>
    %81 = vector.extract_strided_slice %9 {offsets = [0, 0, 16], sizes = [2, 8, 8], strides = [1, 1, 1]} : vector<2x8x32xf32> to vector<2x8x8xf32>
    %82 = arith.truncf %81 : vector<2x8x8xf32> to vector<2x8x8xbf16>
    "tpu.trace_start"() <{level = 10 : i32, message = "btd,bsd->bts"}> : () -> ()
    %cst_22 = arith.constant dense<0.000000e+00> : vector<2x8x8xf32>
    %83 = tpu.matmul %78, %80, %cst_22 {dimension_numbers = #tpu.dot_dimension_numbers<[2], [2], [1], [1], [0, 0, 0, 1, 1, 1], [0], [0]>} : vector<2x8x8xbf16>, vector<2x8x8xbf16>, vector<2x8x8xf32> -> vector<2x8x8xf32>
    "tpu.trace_stop"() : () -> ()
    %cst_23 = arith.constant 0.353553385 : f32
    %84 = vector.broadcast %cst_23 : f32 to vector<2x8x8xf32>
    %85 = arith.mulf %83, %84 : vector<2x8x8xf32>
    %cst_24 = arith.constant 0xFF800000 : f32
    %86 = vector.shape_cast %13 : vector<1x8x8xi1> to vector<1x8x8xi1>
    %87 = vector.broadcast %86 : vector<1x8x8xi1> to vector<2x8x8xi1>
    %88 = vector.broadcast %cst_24 : f32 to vector<2x8x8xf32>
    %89 = arith.select %87, %85, %88 : vector<2x8x8xi1>, vector<2x8x8xf32>
    %cst_25 = arith.constant dense<0xFF800000> : vector<2x8xf32>
    %90 = vector.multi_reduction <maximumf>, %89, %cst_25 [2] : vector<2x8x8xf32> to vector<2x8xf32>
    %91 = vector.shape_cast %90 : vector<2x8xf32> to vector<2x8x1xf32>
    %92 = vector.broadcast %91 : vector<2x8x1xf32> to vector<2x8x8xf32>
    %93 = arith.subf %89, %92 : vector<2x8x8xf32>
    %94 = math.exp %93 : vector<2x8x8xf32>
    %cst_26 = arith.constant dense<0.000000e+00> : vector<2x8xf32>
    %95 = vector.multi_reduction <add>, %94, %cst_26 [2] : vector<2x8x8xf32> to vector<2x8xf32>
    %96 = vector.shape_cast %95 : vector<2x8xf32> to vector<2x8x1xf32>
    %97 = tpu.reciprocal %96 {approx = true} : vector<2x8x1xf32> -> vector<2x8x1xf32>
    %98 = vector.broadcast %97 : vector<2x8x1xf32> to vector<2x8x8xf32>
    %99 = arith.mulf %94, %98 : vector<2x8x8xf32>
    %100 = arith.truncf %99 : vector<2x8x8xf32> to vector<2x8x8xbf16>
    "tpu.trace_start"() <{level = 10 : i32, message = "bts,bsd->btd"}> : () -> ()
    %cst_27 = arith.constant dense<0.000000e+00> : vector<2x8x8xf32>
    %101 = tpu.matmul %100, %82, %cst_27 {dimension_numbers = #tpu.dot_dimension_numbers<[2], [1], [1], [2], [0, 0, 0, 1, 1, 2], [0], [0]>} : vector<2x8x8xbf16>, vector<2x8x8xbf16>, vector<2x8x8xf32> -> vector<2x8x8xf32>
    "tpu.trace_stop"() : () -> ()
    %102 = vector.shape_cast %101 : vector<2x8x8xf32> to vector<16x8xf32>
    %103 = arith.truncf %102 : vector<16x8xf32> to vector<16x8xbf16>
    %c16 = arith.constant 16 : index
    %c0_28 = arith.constant 0 : index
    %104 = vector.load %arg3[%c16, %c0_28] : memref<32x32xbf16, #tpu.memory_space<vmem>>, vector<8x32xbf16>
    %cst_29 = arith.constant dense<0.000000e+00> : vector<16x32xf32>
    %105 = tpu.matmul %103, %104, %cst_29 {dimension_numbers = #tpu.dot_dimension_numbers<[1], [0], [0], [1], [0, 0, 1, 1], [], []>} : vector<16x8xbf16>, vector<8x32xbf16>, vector<16x32xf32> -> vector<16x32xf32>
    %106 = arith.addf %76, %105 : vector<16x32xf32>
    %107 = vector.extract_strided_slice %5 {offsets = [0, 0, 24], sizes = [2, 8, 8], strides = [1, 1, 1]} : vector<2x8x32xf32> to vector<2x8x8xf32>
    %108 = arith.truncf %107 : vector<2x8x8xf32> to vector<2x8x8xbf16>
    %109 = vector.extract_strided_slice %7 {offsets = [0, 0, 24], sizes = [2, 8, 8], strides = [1, 1, 1]} : vector<2x8x32xf32> to vector<2x8x8xf32>
    %110 = arith.truncf %109 : vector<2x8x8xf32> to vector<2x8x8xbf16>
    %111 = vector.extract_strided_slice %9 {offsets = [0, 0, 24], sizes = [2, 8, 8], strides = [1, 1, 1]} : vector<2x8x32xf32> to vector<2x8x8xf32>
    %112 = arith.truncf %111 : vector<2x8x8xf32> to vector<2x8x8xbf16>
    "tpu.trace_start"() <{level = 10 : i32, message = "btd,bsd->bts"}> : () -> ()
    %cst_30 = arith.constant dense<0.000000e+00> : vector<2x8x8xf32>
    %113 = tpu.matmul %108, %110, %cst_30 {dimension_numbers = #tpu.dot_dimension_numbers<[2], [2], [1], [1], [0, 0, 0, 1, 1, 1], [0], [0]>} : vector<2x8x8xbf16>, vector<2x8x8xbf16>, vector<2x8x8xf32> -> vector<2x8x8xf32>
    "tpu.trace_stop"() : () -> ()
    %cst_31 = arith.constant 0.353553385 : f32
    %114 = vector.broadcast %cst_31 : f32 to vector<2x8x8xf32>
    %115 = arith.mulf %113, %114 : vector<2x8x8xf32>
    %cst_32 = arith.constant 0xFF800000 : f32
    %116 = vector.shape_cast %13 : vector<1x8x8xi1> to vector<1x8x8xi1>
    %117 = vector.broadcast %116 : vector<1x8x8xi1> to vector<2x8x8xi1>
    %118 = vector.broadcast %cst_32 : f32 to vector<2x8x8xf32>
    %119 = arith.select %117, %115, %118 : vector<2x8x8xi1>, vector<2x8x8xf32>
    %cst_33 = arith.constant dense<0xFF800000> : vector<2x8xf32>
    %120 = vector.multi_reduction <maximumf>, %119, %cst_33 [2] : vector<2x8x8xf32> to vector<2x8xf32>
    %121 = vector.shape_cast %120 : vector<2x8xf32> to vector<2x8x1xf32>
    %122 = vector.broadcast %121 : vector<2x8x1xf32> to vector<2x8x8xf32>
    %123 = arith.subf %119, %122 : vector<2x8x8xf32>
    %124 = math.exp %123 : vector<2x8x8xf32>
    %cst_34 = arith.constant dense<0.000000e+00> : vector<2x8xf32>
    %125 = vector.multi_reduction <add>, %124, %cst_34 [2] : vector<2x8x8xf32> to vector<2x8xf32>
    %126 = vector.shape_cast %125 : vector<2x8xf32> to vector<2x8x1xf32>
    %127 = tpu.reciprocal %126 {approx = true} : vector<2x8x1xf32> -> vector<2x8x1xf32>
    %128 = vector.broadcast %127 : vector<2x8x1xf32> to vector<2x8x8xf32>
    %129 = arith.mulf %124, %128 : vector<2x8x8xf32>
    %130 = arith.truncf %129 : vector<2x8x8xf32> to vector<2x8x8xbf16>
    "tpu.trace_start"() <{level = 10 : i32, message = "bts,bsd->btd"}> : () -> ()
    %cst_35 = arith.constant dense<0.000000e+00> : vector<2x8x8xf32>
    %131 = tpu.matmul %130, %112, %cst_35 {dimension_numbers = #tpu.dot_dimension_numbers<[2], [1], [1], [2], [0, 0, 0, 1, 1, 2], [0], [0]>} : vector<2x8x8xbf16>, vector<2x8x8xbf16>, vector<2x8x8xf32> -> vector<2x8x8xf32>
    "tpu.trace_stop"() : () -> ()
    %132 = vector.shape_cast %131 : vector<2x8x8xf32> to vector<16x8xf32>
    %133 = arith.truncf %132 : vector<16x8xf32> to vector<16x8xbf16>
    %c24 = arith.constant 24 : index
    %c0_36 = arith.constant 0 : index
    %134 = vector.load %arg3[%c24, %c0_36] : memref<32x32xbf16, #tpu.memory_space<vmem>>, vector<8x32xbf16>
    %cst_37 = arith.constant dense<0.000000e+00> : vector<16x32xf32>
    %135 = tpu.matmul %133, %134, %cst_37 {dimension_numbers = #tpu.dot_dimension_numbers<[1], [0], [0], [1], [0, 0, 1, 1], [], []>} : vector<16x8xbf16>, vector<8x32xbf16>, vector<16x32xf32> -> vector<16x32xf32>
    %136 = arith.addf %106, %135 : vector<16x32xf32>
    %c0_38 = arith.constant 0 : index
    %c0_39 = arith.constant 0 : index
    %137 = vector.load %arg5[%c0_38, %c0_39] : memref<16x32xf32, #tpu.memory_space<vmem>>, vector<16x32xf32>
    tpu.vector_store %arg5[%c0_38, %c0_39], %136 {strides = array<i32>} : memref<16x32xf32, #tpu.memory_space<vmem>>, vector<16x32xf32>,
    return
  }
  func.func @transform_0(%arg0: i32) -> (i32, i32) {
    %c0_i32 = arith.constant 0 : i32
    %c0_i32_0 = arith.constant 0 : i32
    %c0_i32_1 = arith.constant 0 : i32
    return %c0_i32, %c0_i32_0 : i32, i32
  }
  func.func @transform_1(%arg0: i32) -> (i32, i32) {
    %c0_i32 = arith.constant 0 : i32
    %c0_i32_0 = arith.constant 0 : i32
    %c0_i32_1 = arith.constant 0 : i32
    return %c0_i32, %c0_i32_0 : i32, i32
  }
  func.func @transform_2(%arg0: i32) -> (i32, i32) {
    %c0_i32 = arith.constant 0 : i32
    %c0_i32_0 = arith.constant 0 : i32
    %c0_i32_1 = arith.constant 0 : i32
    return %c0_i32, %c0_i32_0 : i32, i32
  }
  func.func @transform_3(%arg0: i32) -> (i32, i32) {
    %c0_i32 = arith.constant 0 : i32
    %c0_i32_0 = arith.constant 0 : i32
    %c0_i32_1 = arith.constant 0 : i32
    return %c0_i32, %c0_i32_0 : i32, i32
  }
  func.func @transform_4(%arg0: i32) -> (i32, i32) {
    %c0_i32 = arith.constant 0 : i32
    %c0_i32_0 = arith.constant 0 : i32
    %c0_i32_1 = arith.constant 0 : i32
    return %c0_i32, %c0_i32_0 : i32, i32
  }
}

</mosaic_0001>

<bundles_post_ra>
// kernel: tpu_custom_call.1
= control target key start
LH: loop header
LB: loop body
LE: loop exit
PB: predicated region body
PF: predicated region fallthrough
CT: control target
= control target key end

     0   :  { %9 = vsyncpa [#allocation3], 0  ;;  %s1086_s0 = inlined_call_operand.hbm [shape: f32[16,32], index: 0, kind: input, shape index: {}]   ;;  %s1087_s1 = inlined_call_operand.hbm [shape: bf16[32,96], index: 1, kind: input, shape index: {}]   ;;  %s1088_s2 = inlined_call_operand.hbm [shape: bf16[32,32], index: 2, kind: input, shape index: {}]   ;;  %s1089_s3 = inlined_call_operand.vmem [shape: f32[1,32], index: 3, kind: input, shape index: {}]   ;;  %s1090_s4 = inlined_call_operand.hbm [shape: f32[16,32], index: 4, kind: output, shape index: {}]  }
   0x1   :  { %10 = vsyncpa [#allocation6], 0  ;;  %s29_s17 = sshll.u32 %s1087_s1, 4  ;;  %s30_s17 = int_to_ptr.hbm [resolvable:$true] %s29_s17 }
   0x2   :  { %11 = vsyncpa [#allocation4], 0  ;;  %s888_s18 = smov [#allocation5]   ;;  %s16_s22 = sshll.u32 %s1086_s0, 4  ;;  %s17_s22 = int_to_ptr.hbm [resolvable:$true] %s16_s22 }
   0x3   :  { %s31_s19 = sshll.u32 %s888_s18, 4  ;;  %s889_s23 = smov 64   ;;  %s32_s19 = int_to_ptr.vmem [resolvable:$true] %s31_s19 }
   0x4   :  { %s890_s24 = smov 4   ;;  %s891_s25 = smov [#allocation2]  }
   0x5   :  { %37 = dma.hbm_to_vmem [thread:$0]  %s30_s17, 256, %s32_s19, [#allocation6], %s889_s23, %s889_s23, %s890_s24  }
   0x6   :  { %s18_s26 = sshll.u32 %s891_s25, 4  ;;  %s892_s27 = smov 128   ;;  %s19_s26 = int_to_ptr.vmem [resolvable:$true] %s18_s26 }
   0x7   :  { %s893_s1 = smov 8   ;;  %s42_s30 = sshll.u32 %s1088_s2, 4  ;;  %s43_s30 = int_to_ptr.hbm [resolvable:$true] %s42_s30 }
   0x8   :  { %24 = dma.hbm_to_vmem [thread:$0]  %s17_s22, 256, %s19_s26, [#allocation3], %s892_s27, %s892_s27, %s893_s1  }
   0x9   :  { %s894_s0 = smov [#allocation7]  }
   0xa   :  { %s44_s5 = sshll.u32 %s894_s0, 4  ;;  %s45_s5 = int_to_ptr.vmem [resolvable:$true] %s44_s5 }
   0xb   :  { %50 = dma.hbm_to_vmem [thread:$0]  %s43_s30, 256, %s45_s5, [#allocation6], %s889_s23, %s889_s23, %s890_s24  }
   0xc   :  { %882 = dma.done.wait [#allocation3], 256  }
   0xd   :  { %883 = vsyncadd [#allocation3], 4294967040 }
   0xe   :  { %884 = dma.done.wait [#allocation6], 512  }
   0xf   :  { %885 = vsyncadd [#allocation6], 4294966784  ;;  %v734_v0 = vld [vmem:[#allocation5 + $0x8] sm:$0xff]  ;;  %v733_v1 = vld [vmem:[#allocation5] sm:$0xff]  ;;  %vm85_vm0 = vcmask 261120   ;;  %s895_s2 = smov 88   ;;  %v103_v26 = vlaneseq }
  0x10   :  { %95 = vmatpush.bf16.msra.mxu0 %v734_v0  ;;  %v947_v2 = vld [vmem:[#allocation2] sm:$0xff]  ;;  %v949_v3 = vld [vmem:[#allocation2 + $0x8] sm:$0xff]  ;;  %s896_s6 = smov 96   ;;  %s897_s7 = smov 120   ;;  %vm121_vm1 = vcmask 64512   ;;  %vm200_vm3 = vcmask 1043456  }
  0x11   :  { %v68_v4 = vpack.c.bf16 %v949_v3, %v947_v2  ;;  %s898_s8 = smov 80   ;;  %s899_s9 = smov 112   ;;  %v104_v27 = vshrl.u32 %v103_v26, 7  ;;  %v106_v28 = vand.u32 127, %v103_v26 }
  0x12   :  { %s900_s10 = smov 56   ;;  %s901_s11 = smov 72  }
  0x13   :  { %vm978_vm2 = vcmp.ge.s32.totalorder %v104_v27, %v106_v28  ;;  %s902_s12 = smov 104   ;;  %s903_s13 = smov 48  }
  0x14   :  { %96 = vmatpush.bf16.msra.mxu0 %v733_v1  ;;  %s904_s14 = smov 40   ;;  %s690_s20 = sshll.u32 %s1090_s4, 4  ;;  %s691_s20 = int_to_ptr.hbm [resolvable:$true] %s690_s20 }
  0x17   :  { %712 = vmatmul.msk.bf16.vlgmr.msra.gmra.mxu0 %vm85_vm0, %v68_v4 }
  0x94   :  { %v98_v5 = vpop.f32.mrf.mxu0 }
  0x95   :  { %v114_v6 = vpack.c.bf16 %v98_v5, %v98_v5 }
  0x97   :  { %v117_v7 = vunpack.c.l.b16 %v114_v6 }
  0x99   :  { %v954_v8 = vpack.c.b16 %v117_v7, %v117_v7 }
  0x9b   :  { %264 = vrot.lane.b32.xlu1 %v954_v8, %s895_s2  ;;  %119 = vrot.lane.b32.xlu0 %v954_v8, %s896_s6 }
  0x9c   :  { %v100_v9 = vpop.f32.mrf.mxu0 }
  0x9d   :  { %v115_v10 = vpack.c.bf16 %v100_v9, %v100_v9 }
  0x9f   :  { %v142_v11 = vunpack.c.l.b16 %v115_v10 }
  0xa1   :  { %v958_v12 = vpack.c.b16 %v142_v11, %v142_v11 }
  0xa3   :  { %262 = vrot.lane.b32.xlu1 %v954_v8, %s897_s7  ;;  %287 = vrot.lane.b32.xlu2 %v958_v12, %s895_s2 }
  0xa4   :  { %144 = vrot.lane.b32.xlu0 %v958_v12, %s896_s6 }
  0xab   :  { %285 = vrot.lane.b32.xlu2 %v958_v12, %s897_s7 }
  0xb3   :  { %404 = vrot.lane.b32.xlu2 %v954_v8, %s898_s8 }
  0xbb   :  { %402 = vrot.lane.b32.xlu2 %v954_v8, %s899_s9 }
  0xfd   :  { %v288_v13 = vpop.permute.xlu2 %287 }
  0xfe   :  { %v293_v21 = vsel %vm121_vm1, %v288_v13, 0 }
 0x105   :  { %v286_v18 = vpop.permute.xlu2 %285 }
 0x10d   :  { %v265_v14 = vpop.permute.xlu1 %264  ;;  %v120_v15 = vpop.permute.xlu0 %119 }
 0x10e   :  { %v126_v16 = vsel %vm121_vm1, %v120_v15, 0  ;;  %v270_v17 = vsel %vm121_vm1, %v265_v14, 0  ;;  %v405_v22 = vpop.permute.xlu2 %404 }
 0x10f   :  { %135 = vmatpush.bf16.xpose.msra.mxu1 %v126_v16  ;;  %v410_v23 = vsel %vm121_vm1, %v405_v22, 0 }
 0x115   :  { %v263_v24 = vpop.permute.xlu1 %262 }
 0x116   :  { %v145_v19 = vpop.permute.xlu0 %144  ;;  %713 = vmatmul.msk.bf16.vlgmr.msra.gmra.mxu1 %vm121_vm1, %v114_v6  ;;  %v403_v25 = vpop.permute.xlu2 %402 }
 0x117   :  { %279 = vmatpush.bf16.xpose.msrb.mxu1 %v270_v17  ;;  %v150_v20 = vsel %vm121_vm1, %v145_v19, 0 }
 0x118   :  { %159 = vmatpush.bf16.xpose.msra.mxu2 %v150_v20 }
 0x11f   :  { %714 = vmatmul.msk.bf16.vlgmr.msra.gmra.mxu2 %vm121_vm1, %v115_v10 }
 0x120   :  { %302 = vmatpush.bf16.xpose.msrb.mxu2 %v293_v21 }
 0x126   :  { %718 = vmatmul.msk.bf16.vlgmr.msrb.gmra.mxu1 %vm121_vm1, %v263_v24 }
 0x128   :  { %419 = vmatpush.bf16.xpose.msra.mxu2 %v410_v23 }
 0x12f   :  { %719 = vmatmul.msk.bf16.vlgmr.msrb.gmra.mxu2 %vm121_vm1, %v286_v18 }
 0x13f   :  { %723 = vmatmul.msk.bf16.vlgmr.msra.gmra.mxu2 %vm121_vm1, %v403_v25 }
 0x193   :  { %v137_v29 = vpop.f32.mrf.mxu1 }
 0x194   :  { %v165_v31 = vmul.f32 0.35355338, %v137_v29 }
 0x196   :  { %v169_v32 = vsel %vm978_vm2, %v165_v31, -inf }
 0x197   :  { %v171_v33 = vsel %vm121_vm1, %v169_v32, -inf }
 0x198   :  { %172 = vmax.xlane.f32.xlu0 %v171_v33  ;;  %v239_v33 = vld [vmem:[#allocation7] sm:$0xf] }
 0x19b   :  { %v139_v34 = vpop.f32.mrf.mxu1 }
 0x1a2   :  { %v161_v35 = vpop.f32.mrf.mxu2 }
 0x1a3   :  { %v166_v36 = vmul.f32 0.35355338, %v161_v35  ;;  %v281_v37 = vpop.f32.mrf.mxu1  ;;  %v244_v35 = vsel %vm200_vm3, %v239_v33, 0 }
 0x1a4   :  { %v308_v38 = vmul.f32 0.35355338, %v281_v37  ;;  %253 = vmatpush.bf16.msrb.mxu0 %v244_v35 }
 0x1a5   :  { %v170_v39 = vsel %vm978_vm2, %v166_v36, -inf }
 0x1a6   :  { %v174_v40 = vsel %vm121_vm1, %v170_v39, -inf  ;;  %v310_v41 = vsel %vm978_vm2, %v308_v38, -inf }
 0x1a7   :  { %175 = vmax.xlane.f32.xlu1 %v174_v40  ;;  %v312_v42 = vsel %vm121_vm1, %v310_v41, -inf  ;;  %v379_v40 = vld [vmem:[#allocation7 + $0x4] sm:$0xf] }
 0x1a8   :  { %313 = vmax.xlane.f32.xlu0 %v312_v42  ;;  %v384_v42 = vsel %vm200_vm3, %v379_v40, 0 }
 0x1a9   :  { %393 = vmatpush.bf16.msra.mxu1 %v384_v42 }
 0x1aa   :  { %v163_v43 = vpop.f32.mrf.mxu2 }
 0x1ab   :  { %v283_v44 = vpop.f32.mrf.mxu1 }
 0x1b2   :  { %v304_v45 = vpop.f32.mrf.mxu2 }
 0x1b3   :  { %v309_v7 = vmul.f32 0.35355338, %v304_v45 }
 0x1b5   :  { %v311_v9 = vsel %vm978_vm2, %v309_v7, -inf }
 0x1b6   :  { %v315_v10 = vsel %vm121_vm1, %v311_v9, -inf }
 0x1ba   :  { %v306_v46 = vpop.f32.mrf.mxu2 }
 0x1c0   :  { %195 = vrot.lane.b32.xlu1 %v954_v8, %s889_s23 }
 0x1c2   :  { %v421_v47 = vpop.f32.mrf.mxu2 }
 0x1c3   :  { %v448_v49 = vmul.f32 0.35355338, %v421_v47 }
 0x1c5   :  { %v450_v50 = vsel %vm978_vm2, %v448_v49, -inf }
 0x1c6   :  { %v452_v51 = vsel %vm121_vm1, %v450_v50, -inf }
 0x1c8   :  { %427 = vrot.lane.b32.xlu1 %v958_v12, %s898_s8 }
 0x1ca   :  { %v423_v48 = vpop.f32.mrf.mxu2 }
 0x1d0   :  { %425 = vrot.lane.b32.xlu1 %v958_v12, %s899_s9 }
 0x1fa   :  { %453 = vmax.xlane.f32.xlu1 %v452_v51 }
 0x20b   :  { %v173_v52 = vpop.xlane.xlu0 %172 }
 0x20c   :  { %v177_v53 = vsub.f32 %v169_v32, %v173_v52 }
 0x20e   :  { %v179_v54 = vmul.f32 1.442695, %v177_v53 }
 0x210   :  { %754 = vpow2.f32 %v179_v54 }
 0x216   :  { %v755_v55 = vpop.eup %754 }
 0x217   :  { %v183_v56 = vsel %vm121_vm1, %v755_v55, 0.0 }
 0x218   :  { %184 = vadd.xlane.f32.xlu2 %v183_v56 }
 0x21a   :  { %v176_v57 = vpop.xlane.xlu1 %175 }
 0x21b   :  { %v178_v58 = vsub.f32 %v170_v39, %v176_v57  ;;  %v314_v59 = vpop.xlane.xlu0 %313 }
 0x21c   :  { %v318_v61 = vsub.f32 %v310_v41, %v314_v59 }
 0x21d   :  { %v181_v60 = vmul.f32 1.442695, %v178_v58 }
 0x21e   :  { %v320_v62 = vmul.f32 1.442695, %v318_v61 }
 0x21f   :  { %756 = vpow2.f32 %v181_v60 }
 0x220   :  { %758 = vpow2.f32 %v320_v62 }
 0x225   :  { %v757_v63 = vpop.eup %756 }
 0x226   :  { %v186_v0 = vsel %vm121_vm1, %v757_v63, 0.0  ;;  %v759_v1 = vpop.eup %758 }
 0x227   :  { %187 = vadd.xlane.f32.xlu0 %v186_v0  ;;  %v324_v4 = vsel %vm121_vm1, %v759_v1, 0.0 }
 0x22f   :  { %325 = vadd.xlane.f32.xlu0 %v324_v4 }
 0x230   :  { %217 = vrot.lane.b32.xlu2 %v958_v12, %s889_s23 }
 0x232   :  { %v196_v5 = vpop.permute.xlu1 %195 }
 0x233   :  { %v202_v6 = vsel %vm200_vm3, %v196_v5, 0 }
 0x234   :  { %211 = vmatpush.bf16.msra.mxu3 %v202_v6 }
 0x23a   :  { %v428_v11 = vpop.permute.xlu1 %427 }
 0x23b   :  { %v433_v37 = vsel %vm121_vm1, %v428_v11, 0 }
 0x242   :  { %v426_v13 = vpop.permute.xlu1 %425 }
 0x243   :  { %336 = vrot.lane.b32.xlu0 %v954_v8, %s900_s10 }
 0x259   :  { %316 = vmax.xlane.f32.xlu2 %v315_v10 }
 0x26d   :  { %v454_v14 = vpop.xlane.xlu1 %453 }
 0x26e   :  { %v458_v15 = vsub.f32 %v450_v50, %v454_v14 }
 0x270   :  { %v460_v16 = vmul.f32 1.442695, %v458_v15 }
 0x271   :  { %357 = vrot.lane.b32.xlu2 %v958_v12, %s900_s10 }
 0x272   :  { %760 = vpow2.f32 %v460_v16 }
 0x278   :  { %v1011_v17 = vpop.eup %760 }
 0x279   :  { %v464_v18 = vsel %vm121_vm1, %v1011_v17, 0.0  ;;  %567 = vrot.lane.b32.xlu2 %v958_v12, %s901_s11 }
 0x27a   :  { %465 = vadd.xlane.f32.xlu1 %v464_v18 }
 0x281   :  { %565 = vrot.lane.b32.xlu2 %v958_v12, %s902_s12 }
 0x289   :  { %497 = vrot.lane.b32.xlu2 %v958_v12, %s903_s13 }
 0x28b   :  { %v185_v19 = vpop.xlane.xlu2 %184 }
 0x28c   :  { %762 = vrcp.f32 %v185_v19 }
 0x292   :  { %v763_v20 = vpop.eup %762 }
 0x293   :  { %544 = vrot.lane.b32.xlu1 %v954_v8, %s901_s11  ;;  %v218_v21 = vpop.permute.xlu2 %217  ;;  %v191_v22 = vmul.f32 %v763_v20, %v755_v55 }
 0x294   :  { %v223_v23 = vsel %vm200_vm3, %v218_v21, 0 }
 0x295   :  { %232 = vmatpush.bf16.msrb.mxu3 %v223_v23  ;;  %v193_v24 = vpack.c.bf16 %v191_v22, %v191_v22 }
 0x297   :  { %715 = vmatmul.msk.bf16.vlgmr.msra.gmra.mxu3 %vm121_vm1, %v193_v24 }
 0x29a   :  { %v188_v25 = vpop.xlane.xlu0 %187 }
 0x29b   :  { %764 = vrcp.f32 %v188_v25 }
 0x2a1   :  { %v765_v26 = vpop.eup %764 }
 0x2a2   :  { %v192_v27 = vmul.f32 %v765_v26, %v757_v63  ;;  %v326_v29 = vpop.xlane.xlu0 %325 }
 0x2a3   :  { %766 = vrcp.f32 %v326_v29 }
 0x2a4   :  { %v194_v28 = vpack.c.bf16 %v192_v27, %v192_v27 }
 0x2a7   :  { %716 = vmatmul.msk.bf16.vlgmr.msrb.gmra.mxu3 %vm121_vm1, %v194_v28 }
 0x2a9   :  { %v767_v31 = vpop.eup %766 }
 0x2aa   :  { %v332_v32 = vmul.f32 %v767_v31, %v759_v1 }
 0x2ac   :  { %v334_v38 = vpack.c.bf16 %v332_v32, %v332_v32 }
 0x2b5   :  { %v337_v34 = vpop.permute.xlu0 %336 }
 0x2b6   :  { %v342_v36 = vsel %vm200_vm3, %v337_v34, 0 }
 0x2b7   :  { %351 = vmatpush.bf16.msra.mxu3 %v342_v36 }
 0x2ba   :  { %720 = vmatmul.msk.bf16.vlgmr.msra.gmra.mxu3 %vm121_vm1, %v334_v38 }
 0x2bb   :  { %442 = vmatpush.bf16.xpose.msrb.mxu3 %v433_v37 }
 0x2ca   :  { %724 = vmatmul.msk.bf16.vlgmr.msrb.gmra.mxu3 %vm121_vm1, %v426_v13 }
 0x2cc   :  { %v317_v39 = vpop.xlane.xlu2 %316 }
 0x2cd   :  { %v319_v41 = vsub.f32 %v311_v9, %v317_v39 }
 0x2cf   :  { %v322_v43 = vmul.f32 1.442695, %v319_v41 }
 0x2d1   :  { %768 = vpow2.f32 %v322_v43  ;;  %v753_v43 = vld [vmem:[%s1089_s3] ss:$0 sm:$0xff]  ;;  %s905_s3 = smov [#allocation8]  }
 0x2d2   :  { %s688_s17 = sshll.u32 %s905_s3, 4  ;;  %s689_s17 = int_to_ptr.vmem [resolvable:$true] %s688_s17 }
 0x2d4   :  { %v358_v44 = vpop.permute.xlu2 %357 }
 0x2d5   :  { %v363_v45 = vsel %vm200_vm3, %v358_v44, 0 }
 0x2d6   :  { %372 = vmatpush.bf16.msra.mxu0 %v363_v45 }
 0x2d7   :  { %v769_v46 = vpop.eup %768 }
 0x2d8   :  { %v327_v47 = vsel %vm121_vm1, %v769_v46, 0.0 }
 0x2d9   :  { %328 = vadd.xlane.f32.xlu0 %v327_v47 }
 0x2dc   :  { %v568_v48 = vpop.permute.xlu2 %567 }
 0x2dd   :  { %v573_v14 = vsel %vm121_vm1, %v568_v48, 0 }
 0x2e4   :  { %v566_v49 = vpop.permute.xlu2 %565 }
 0x2ec   :  { %v498_v50 = vpop.permute.xlu2 %497 }
 0x2ed   :  { %v503_v51 = vsel %vm200_vm3, %v498_v50, 0  ;;  %476 = vrot.lane.b32.xlu0 %v954_v8, %s903_s13  ;;  %v466_v52 = vpop.xlane.xlu1 %465 }
 0x2ee   :  { %512 = vmatpush.bf16.msrb.mxu1 %v503_v51 }
 0x2f5   :  { %542 = vrot.lane.b32.xlu0 %v954_v8, %s902_s12 }
 0x305   :  { %v545_v53 = vpop.permute.xlu1 %544 }
 0x306   :  { %v550_v54 = vsel %vm121_vm1, %v545_v53, 0 }
 0x307   :  { %559 = vmatpush.bf16.xpose.msra.mxu3 %v550_v54 }
 0x31a   :  { %v213_v55 = vpop.f32.mrf.mxu3 }
 0x322   :  { %v215_v56 = vpop.f32.mrf.mxu3 }
 0x32a   :  { %v234_v57 = vpop.f32.mrf.mxu3 }
 0x32b   :  { %v238_v58 = vpack.c.bf16 %v234_v57, %v213_v55 }
 0x32d   :  { %717 = vmatmul.msk.bf16.vlgmr.msrb.gmra.mxu0 %vm121_vm1, %v238_v58 }
 0x332   :  { %v236_v59 = vpop.f32.mrf.mxu3 }
 0x333   :  { %v519_v59 = vld [vmem:[#allocation7 + $0x8] sm:$0xf] }
 0x33d   :  { %v353_v60 = vpop.f32.mrf.mxu3 }
 0x345   :  { %v355_v61 = vpop.f32.mrf.mxu3 }
 0x34c   :  { %v329_v62 = vpop.xlane.xlu0 %328 }
 0x34d   :  { %v444_v63 = vpop.f32.mrf.mxu3  ;;  %770 = vrcp.f32 %v329_v62 }
 0x34e   :  { %v449_v0 = vmul.f32 0.35355338, %v444_v63  ;;  %772 = vrcp.f32 %v466_v52 }
 0x350   :  { %v451_v1 = vsel %vm978_vm2, %v449_v0, -inf }
 0x351   :  { %v455_v4 = vsel %vm121_vm1, %v451_v1, -inf }
 0x352   :  { %456 = vmax.xlane.f32.xlu0 %v455_v4 }
 0x353   :  { %v771_v5 = vpop.eup %770 }
 0x354   :  { %v333_v6 = vmul.f32 %v771_v5, %v769_v46  ;;  %v773_v10 = vpop.eup %772  ;;  %v112_v46 = vadd.f32 %v753_v43, %v947_v2 }
 0x355   :  { %v446_v7 = vpop.f32.mrf.mxu3  ;;  %v472_v15 = vmul.f32 %v773_v10, %v1011_v17 }
 0x356   :  { %v335_v9 = vpack.c.bf16 %v333_v6, %v333_v6 }
 0x357   :  { %v474_v16 = vpack.c.bf16 %v472_v15, %v472_v15  ;;  %v113_v15 = vadd.f32 %v753_v43, %v949_v3 }
 0x358   :  { %721 = vmatmul.msk.bf16.vlgmr.msra.gmra.mxu0 %vm121_vm1, %v335_v9 }
 0x35f   :  { %v477_v11 = vpop.permute.xlu0 %476 }
 0x360   :  { %v482_v13 = vsel %vm200_vm3, %v477_v11, 0 }
 0x361   :  { %491 = vmatpush.bf16.msrb.mxu0 %v482_v13 }
 0x365   :  { %582 = vmatpush.bf16.xpose.msra.mxu0 %v573_v14 }
 0x367   :  { %v543_v18 = vpop.permute.xlu0 %542 }
 0x368   :  { %725 = vmatmul.msk.bf16.vlgmr.msrb.gmra.mxu0 %vm121_vm1, %v474_v16  ;;  %728 = vmatmul.msk.bf16.vlgmr.msra.gmra.mxu3 %vm121_vm1, %v543_v18 }
 0x378   :  { %729 = vmatmul.msk.bf16.vlgmr.msra.gmra.mxu0 %vm121_vm1, %v566_v49 }
 0x3aa   :  { %v255_v19 = vpop.f32.mrf.mxu0 }
 0x3ab   :  { %v260_v30 = vadd.f32 %v255_v19, %v112_v46 }
 0x3b2   :  { %v1049_v23 = vpop.f32.mrf.mxu0 }
 0x3b3   :  { %v261_v18 = vadd.f32 %v1049_v23, %v113_v15 }
 0x3c5   :  { %v457_v20 = vpop.xlane.xlu0 %456 }
 0x3c6   :  { %v459_v21 = vsub.f32 %v451_v1, %v457_v20 }
 0x3c8   :  { %v462_v22 = vmul.f32 1.442695, %v459_v21 }
 0x3ca   :  { %774 = vpow2.f32 %v462_v22 }
 0x3d0   :  { %v775_v24 = vpop.eup %774 }
 0x3d1   :  { %v467_v25 = vsel %vm121_vm1, %v775_v24, 0.0 }
 0x3d2   :  { %468 = vadd.xlane.f32.xlu1 %v467_v25 }
 0x3d5   :  { %v374_v17 = vpop.f32.mrf.mxu0 }
 0x3d6   :  { %v378_v26 = vpack.c.bf16 %v374_v17, %v353_v60  ;;  %v524_v60 = vsel %vm200_vm3, %v519_v59, 0 }
 0x3d7   :  { %533 = vmatpush.bf16.msrb.mxu2 %v524_v60 }
 0x3d8   :  { %722 = vmatmul.msk.bf16.vlgmr.msra.gmra.mxu1 %vm121_vm1, %v378_v26 }
 0x3dd   :  { %v376_v27 = vpop.f32.mrf.mxu0 }
 0x3e5   :  { %v493_v28 = vpop.f32.mrf.mxu0 }
 0x3eb   :  { %v561_v29 = vpop.f32.mrf.mxu3 }
 0x3ec   :  { %v588_v31 = vmul.f32 0.35355338, %v561_v29 }
 0x3ed   :  { %v495_v32 = vpop.f32.mrf.mxu0 }
 0x3ee   :  { %v590_v33 = vsel %vm978_vm2, %v588_v31, -inf }
 0x3ef   :  { %v592_v34 = vsel %vm121_vm1, %v590_v33, -inf }
 0x3f0   :  { %593 = vmax.xlane.f32.xlu0 %v592_v34 }
 0x3f3   :  { %v563_v35 = vpop.f32.mrf.mxu3 }
 0x3f5   :  { %v584_v36 = vpop.f32.mrf.mxu0 }
 0x3f6   :  { %v589_v37 = vmul.f32 0.35355338, %v584_v36 }
 0x3f8   :  { %v591_v38 = vsel %vm978_vm2, %v589_v37, -inf }
 0x3f9   :  { %v595_v39 = vsel %vm121_vm1, %v591_v38, -inf }
 0x3fa   :  { %596 = vmax.xlane.f32.xlu2 %v595_v39 }
 0x3fd   :  { %v586_v40 = vpop.f32.mrf.mxu0 }
 0x412   :  { %616 = vrot.lane.b32.xlu2 %v954_v8, %s904_s14 }
 0x445   :  { %v469_v41 = vpop.xlane.xlu1 %468 }
 0x446   :  { %776 = vrcp.f32 %v469_v41 }
 0x44c   :  { %v777_v42 = vpop.eup %776 }
 0x44d   :  { %v473_v44 = vmul.f32 %v777_v42, %v775_v24  ;;  %v659_v24 = vld [vmem:[#allocation7 + $0xc] sm:$0xf] }
 0x44e   :  { %v664_v25 = vsel %vm200_vm3, %v659_v24, 0 }
 0x44f   :  { %v475_v45 = vpack.c.bf16 %v473_v44, %v473_v44  ;;  %673 = vmatpush.bf16.msrb.mxu3 %v664_v25 }
 0x451   :  { %726 = vmatmul.msk.bf16.vlgmr.msrb.gmra.mxu1 %vm121_vm1, %v475_v45 }
 0x455   :  { %v395_v47 = vpop.f32.mrf.mxu1 }
 0x456   :  { %v400_v48 = vadd.f32 %v395_v47, %v260_v30 }
 0x45d   :  { %v397_v61 = vpop.f32.mrf.mxu1 }
 0x45e   :  { %v401_v19 = vadd.f32 %v397_v61, %v261_v18 }
 0x463   :  { %v594_v49 = vpop.xlane.xlu0 %593 }
 0x464   :  { %v598_v50 = vsub.f32 %v590_v33, %v594_v49 }
 0x466   :  { %v600_v51 = vmul.f32 1.442695, %v598_v50 }
 0x468   :  { %778 = vpow2.f32 %v600_v51 }
 0x46d   :  { %v597_v8 = vpop.xlane.xlu2 %596 }
 0x46e   :  { %v779_v52 = vpop.eup %778  ;;  %v599_v53 = vsub.f32 %v591_v38, %v597_v8 }
 0x46f   :  { %v604_v54 = vsel %vm121_vm1, %v779_v52, 0.0 }
 0x470   :  { %v602_v55 = vmul.f32 1.442695, %v599_v53  ;;  %605 = vadd.xlane.f32.xlu0 %v604_v54 }
 0x472   :  { %780 = vpow2.f32 %v602_v55 }
 0x475   :  { %v617_v56 = vpop.permute.xlu2 %616 }
 0x476   :  { %v622_v2 = vsel %vm200_vm3, %v617_v56, 0 }
 0x477   :  { %631 = vmatpush.bf16.msra.mxu1 %v622_v2 }
 0x478   :  { %v781_v57 = vpop.eup %780 }
 0x479   :  { %v607_v58 = vsel %vm121_vm1, %v781_v57, 0.0 }
 0x47a   :  { %608 = vadd.xlane.f32.xlu1 %v607_v58 }
 0x493   :  { %637 = vrot.lane.b32.xlu1 %v958_v12, %s904_s14 }
 0x4ce   :  { %v514_v62 = vpop.f32.mrf.mxu1 }
 0x4cf   :  { %v518_v63 = vpack.c.bf16 %v514_v62, %v493_v28 }
 0x4d1   :  { %727 = vmatmul.msk.bf16.vlgmr.msrb.gmra.mxu2 %vm121_vm1, %v518_v63 }
 0x4d6   :  { %v516_v0 = vpop.f32.mrf.mxu1 }
 0x4e3   :  { %v606_v1 = vpop.xlane.xlu0 %605 }
 0x4e4   :  { %782 = vrcp.f32 %v606_v1 }
 0x4ea   :  { %v783_v4 = vpop.eup %782 }
 0x4eb   :  { %v612_v5 = vmul.f32 %v783_v4, %v779_v52 }
 0x4ed   :  { %v614_v6 = vpack.c.bf16 %v612_v5, %v612_v5  ;;  %v609_v7 = vpop.xlane.xlu1 %608 }
 0x4ee   :  { %784 = vrcp.f32 %v609_v7 }
 0x4ef   :  { %730 = vmatmul.msk.bf16.vlgmr.msra.gmra.mxu1 %vm121_vm1, %v614_v6 }
 0x4f4   :  { %v785_v12 = vpop.eup %784 }
 0x4f5   :  { %v613_v9 = vmul.f32 %v785_v12, %v781_v57 }
 0x4f7   :  { %v615_v13 = vpack.c.bf16 %v613_v9, %v613_v9 }
 0x505   :  { %v638_v10 = vpop.permute.xlu1 %637 }
 0x506   :  { %v643_v11 = vsel %vm200_vm3, %v638_v10, 0 }
 0x507   :  { %652 = vmatpush.bf16.msra.mxu2 %v643_v11 }
 0x50a   :  { %731 = vmatmul.msk.bf16.vlgmr.msra.gmra.mxu2 %vm121_vm1, %v615_v13 }
 0x554   :  { %v535_v14 = vpop.f32.mrf.mxu2 }
 0x555   :  { %v540_v16 = vadd.f32 %v535_v14, %v400_v48 }
 0x55c   :  { %v537_v20 = vpop.f32.mrf.mxu2 }
 0x55d   :  { %v541_v21 = vadd.f32 %v537_v20, %v401_v19 }
 0x56c   :  { %v633_v22 = vpop.f32.mrf.mxu1 }
 0x574   :  { %v635_v17 = vpop.f32.mrf.mxu1 }
 0x58d   :  { %v654_v26 = vpop.f32.mrf.mxu2 }
 0x58e   :  { %v658_v27 = vpack.c.bf16 %v654_v26, %v633_v22 }
 0x590   :  { %732 = vmatmul.msk.bf16.vlgmr.msrb.gmra.mxu3 %vm121_vm1, %v658_v27 }
 0x595   :  { %v656_v28 = vpop.f32.mrf.mxu2 }
 0x613   :  { %v675_v29 = vpop.f32.mrf.mxu3 }
 0x614   :  { %v680_v31 = vadd.f32 %v675_v29, %v540_v16 }
 0x616   :  { %682 = vst.msk [vmem:[#allocation8] sm:$0xff] %vm85_vm0, %v680_v31 }
 0x61b   :  { %v677_v3 = vpop.f32.mrf.mxu3 }
 0x61c   :  { %v681_v23 = vadd.f32 %v677_v3, %v541_v21 }
 0x61e   :  { %683 = vst.msk [vmem:[#allocation8 + $0x8] sm:$0xff] %vm85_vm0, %v681_v23 }
 0x61f   :  { %696 = dma.vmem_to_hbm [thread:$0]  %s689_s17, 256, %s691_s20, [#allocation4], %s892_s27, %s892_s27, %s893_s1  }
 0x620   :  { %886 = dma.done.wait [#allocation4], 256  }
 0x621   :  { %887 = vsyncadd [#allocation4], 4294967040 }
 0x622   :  { %701 = vsyncpa [#allocation3], 1 }
 0x623   :  { %702 = vsyncpa [#allocation6], 1 }
 0x624   :  { %703 = vsyncpa [#allocation4], 1 }

</bundles_post_ra>
